<compile_context>
chip_gen: v6e
topology: v6e:2x2x1
jax: 0.10.0
libtpu: 0.0.40
codegen_flags: <defaults>
</compile_context>

<pallas_src>
import math
from fractions import Fraction

import numpy as np
import jax
import jax.numpy as jnp
from jax.experimental import pallas as pl
from jax.experimental.pallas import tpu as pltpu

ALPHABET = ["w", "x", "v", "n", "z", "r", "t", "y", "u", "o", "p", "s"]

_HIGHEST = jax.lax.Precision.HIGHEST


# ----------------------------------------------------------------------------
# e3nn-equivalent constant generation (NumPy, runs at "module init" time)
# ----------------------------------------------------------------------------
def _fact(n):
    return math.factorial(round(n))


def _su2_cg_coeff(j1, m1, j2, m2, j3, m3):
    if m3 != m1 + m2:
        return 0.0
    vmin = int(max(-j1 + j2 + m3, -j1 + m1, 0))
    vmax = int(min(j2 + j3 + m1, j3 - j1 + j2, j3 + m3))
    C = ((2.0 * j3 + 1.0) * Fraction(
        _fact(j3 + j1 - j2) * _fact(j3 - j1 + j2) * _fact(j1 + j2 - j3)
        * _fact(j3 + m3) * _fact(j3 - m3),
        _fact(j1 + j2 + j3 + 1) * _fact(j1 - m1) * _fact(j1 + m1)
        * _fact(j2 - m2) * _fact(j2 + m2))) ** 0.5
    S = 0
    for v in range(vmin, vmax + 1):
        S += (-1) ** (v + j2 + m2) * Fraction(
            _fact(j2 + j3 + m1 - v) * _fact(j1 - m1 + v),
            _fact(v) * _fact(j3 - j1 + j2 - v) * _fact(j3 + m3 - v)
            * _fact(v + j1 - j2 - m3))
    return float(C * S)


def _su2_cg(j1, j2, j3):
    mat = np.zeros((2 * j1 + 1, 2 * j2 + 1, 2 * j3 + 1), dtype=np.float64)
    if abs(j1 - j2) <= j3 <= j1 + j2:
        for m1 in range(-j1, j1 + 1):
            for m2 in range(-j2, j2 + 1):
                if abs(m1 + m2) <= j3:
                    mat[m1 + j1, m2 + j2, m1 + m2 + j3] = _su2_cg_coeff(
                        j1, m1, j2, m2, j3, m1 + m2)
    return mat


def _change_basis_real_to_complex(l):
    q = np.zeros((2 * l + 1, 2 * l + 1), dtype=np.complex128)
    for m in range(-l, 0):
        q[l + m, l + abs(m)] = 1.0 / np.sqrt(2.0)
        q[l + m, l - abs(m)] = -1j / np.sqrt(2.0)
    q[l, l] = 1.0
    for m in range(1, l + 1):
        q[l + m, l + abs(m)] = (-1) ** m / np.sqrt(2.0)
        q[l + m, l - abs(m)] = 1j * (-1) ** m / np.sqrt(2.0)
    return (-1j) ** l * q


def wigner_3j(l1, l2, l3):
    C = _su2_cg(l1, l2, l3).astype(np.complex128)
    Q1 = _change_basis_real_to_complex(l1)
    Q2 = _change_basis_real_to_complex(l2)
    Q3 = _change_basis_real_to_complex(l3)
    C = np.einsum("ij,kl,mn,ikn->jlm", Q1, Q2, np.conj(Q3.T), C)
    assert np.abs(C.imag).max() < 1e-8
    C = C.real
    n = np.linalg.norm(C)
    return C / n if n > 0 else C


# irreps are lists of (mul, (l, p)); irrep is (l, p)
def _ir_dim(ir):
    return 2 * ir[0] + 1


def _irreps_dim(irreps):
    return sum(mul * _ir_dim(ir) for mul, ir in irreps)


def _ir_mul(ir1, ir2):
    (l1, p1), (l2, p2) = ir1, ir2
    return [(l, p1 * p2) for l in range(abs(l1 - l2), l1 + l2 + 1)]


def _ir_sort_key(ir):
    l, p = ir
    return (l, -p * (-1) ** l)


def _wigner_nj(irrepss):
    if len(irrepss) == 1:
        (irreps,) = irrepss
        ret = []
        e = np.eye(_irreps_dim(irreps), dtype=np.float64)
        i = 0
        for mul, ir in irreps:
            for _ in range(mul):
                ret.append((ir, e[i:i + _ir_dim(ir)]))
                i += _ir_dim(ir)
        return ret
    *irrepss_left, irreps_right = irrepss
    ret = []
    for ir_left, C_left in _wigner_nj(irrepss_left):
        i = 0
        for mul, ir in irreps_right:
            for ir_out in _ir_mul(ir_left, ir):
                C = wigner_3j(ir_out[0], ir_left[0], ir[0])
                C = C * (_ir_dim(ir_out) ** 0.5)  # 'component' normalization
                C = np.einsum("jk,ijl->ikl", C_left.reshape(C_left.shape[0], -1), C)
                C = C.reshape(_ir_dim(ir_out),
                              *(_irreps_dim(x) for x in irrepss_left),
                              _ir_dim(ir))
                for u in range(mul):
                    E = np.zeros((_ir_dim(ir_out),
                                  *(_irreps_dim(x) for x in irrepss_left),
                                  _irreps_dim(irreps_right)), dtype=np.float64)
                    sl = slice(i + u * _ir_dim(ir), i + (u + 1) * _ir_dim(ir))
                    E[..., sl] = C
                    ret.append((ir_out, E))
            i += mul * _ir_dim(ir)
    return sorted(ret, key=lambda t: _ir_sort_key(t[0]))


def U_matrix_real(irreps_in, irreps_out, correlation):
    # TODO(synk): the correlation==4 parity filter (filter_ir_mid) of the
    # reference is not implemented; build_contraction_params asserts corr<=3.
    out_irs = [ir for _, ir in irreps_out]
    wigners = _wigner_nj([irreps_in] * correlation)
    current_ir = wigners[0][0]
    stack = None
    for ir, base in wigners:
        if ir in out_irs and ir == current_ir:
            b = np.squeeze(base)[..., None]
            stack = b if stack is None else np.concatenate([stack, b], axis=-1)
        elif ir in out_irs and ir != current_ir:
            stack = np.squeeze(base)[..., None]
            current_ir = ir
        else:
            current_ir = ir
    return stack


# ----------------------------------------------------------------------------
# Glue: permute/flatten U tensors into the kernel layout
# ----------------------------------------------------------------------------
def _prep_main_U(U, lmax, L):
    # torch U axes: ([eq], w_1..w_{corr-1}, i, k).  Produce (i, k, m) with flat
    # m ordered (w_{corr-1}, ..., w_1, [eq]).
    nd = U.ndim
    P = U.shape[-1]
    if lmax >= 1:
        w_axes = list(range(1, nd - 2))
        perm = [nd - 2, nd - 1] + w_axes[::-1] + [0]
    else:
        w_axes = list(range(0, nd - 2))
        perm = [nd - 2, nd - 1] + w_axes[::-1]
    Up = np.ascontiguousarray(np.transpose(U, perm))
    return Up.reshape(L, P, -1)


def _prep_loop_U(U, lmax, L):
    # torch U axes: ([eq], w_1..w_nu, k).  Produce (k, m) with flat m ordered
    # (w_nu, ..., w_1, [eq]).
    nd = U.ndim
    P = U.shape[-1]
    if lmax >= 1:
        w_axes = list(range(1, nd - 1))
        perm = [nd - 1] + w_axes[::-1] + [0]
    else:
        w_axes = list(range(0, nd - 1))
        perm = [nd - 1] + w_axes[::-1]
    Up = np.ascontiguousarray(np.transpose(U, perm))
    return Up.reshape(P, -1)


def build_contraction_params(key, irreps_in, ir_out, correlation, num_elements):
    assert 1 <= correlation <= 3, (
        "correlation==4 (parity filter) is not implemented")
    C = sum(mul for mul, ir in irreps_in if ir == (0, 1))  # num_features
    coupling = [(1, ir) for _, ir in irreps_in]            # coupling_irreps
    L = _irreps_dim(coupling)
    lmax = ir_out[0]
    eqdim = 2 * lmax + 1
    U = {nu: U_matrix_real(coupling, [(1, ir_out)], nu)
         for nu in range(1, correlation + 1)}
    W = {}
    for nu in range(correlation, 0, -1):
        P = U[nu].shape[-1]
        key, sub = jax.random.split(key)
        W[nu] = jax.random.normal(sub, (num_elements, P, C), dtype=jnp.float32) / P

    # Per-stage metadata for the transposed (rows-on-lanes) kernel layout.
    # Every stage becomes:  c = U_T @ Wb (+ prev),  out = sum_i x_i * c[i*m:(i+1)*m].
    stages = []
    Um = _prep_main_U(U[correlation], lmax, L)              # (L, P, Mmain)
    Lm, Pm, Mm = Um.shape
    UT = np.ascontiguousarray(np.transpose(Um, (0, 2, 1))).reshape(Lm * Mm, Pm)
    stages.append(dict(UT=jnp.asarray(UT, jnp.float32), W=W[correlation], m_out=Mm))
    prev_m = Mm
    for nu in range(correlation - 1, 0, -1):
        Ul = _prep_loop_U(U[nu], lmax, L)                   # (P, Mfull)
        Pn, Mfull = Ul.shape
        assert Mfull == prev_m and Mfull % L == 0
        UT = np.ascontiguousarray(Ul.T)                     # (Mfull, P)
        stages.append(dict(UT=jnp.asarray(UT, jnp.float32), W=W[nu],
                           m_out=Mfull // L))
        prev_m = Mfull // L
    assert prev_m == eqdim

    params = dict(
        L=L, C=C, eqdim=eqdim, lmax=lmax, correlation=correlation,
        stages=stages, W=W,
        U_ref={nu: jnp.asarray(U[nu], jnp.float32) for nu in U},
    )
    return params, key


def build_symmetric_contraction(key, irreps_in, irreps_out, correlation, num_elements):
    contractions = []
    for _, ir_out in irreps_out:
        p, key = build_contraction_params(key, irreps_in, ir_out, correlation,
                                          num_elements)
        contractions.append(p)
    return contractions, key


# ----------------------------------------------------------------------------
# Fused Pallas kernel: all Contractions, transposed rows-on-lanes layout
# ----------------------------------------------------------------------------
def _make_kernel(stage_meta, eq_info, L, E):
    def kernel(*refs):
        stream_ref, out_ref = refs[0], refs[-1]
        consts = refs[1:-1]
        stream = stream_ref[...].astype(jnp.float32)        # (L+E, TR) f32
        xrow = [stream[i:i + 1, :] for i in range(L)]       # (1, TR) each
        yrow = [stream[L + e:L + e + 1, :] for e in range(E)]
        ci = 0
        for (off, eq), stages in zip(eq_info, stage_meta):
            out = None
            for (R, P, m_out) in stages:
                ut = consts[ci][...]                         # (R, P)  f32 const
                wl = consts[ci + 1]                          # (E, P, TR) const
                ci += 2
                # Wb[k, n] = sum_e y[n, e] * W[e, k, n % C]  (E fused mul-adds)
                wbt = yrow[0] * wl[0]
                for e in range(1, E):
                    wbt = wbt + yrow[e] * wl[e]              # (P, TR)
                # One MXU matmul per stage (U pre-transposed offline).
                c = jnp.dot(ut, wbt, preferred_element_type=jnp.float32)
                if out is not None:                          # recursive stage
                    c = c + out
                # Contract the leading irrep index against x (lane-dense VPU).
                acc = xrow[0] * c[0:m_out, :]
                for i in range(1, L):
                    acc = acc + xrow[i] * c[i * m_out:(i + 1) * m_out, :]
                out = acc                                    # (m_out, TR)
            out_ref[off:off + eq, :] = out                   # lane-dense store
    return kernel


def symmetric_contraction_pallas(x, y, contractions, tile_n=2048,
                                 stream_dtype=jnp.float32):
    """Fused SymmetricContraction forward.

    x: (B, C, L) node features, y: (B, E) one-hot element attributes.
    Layout: N = B*C (node, channel) pairs on the 128-lane axis; one
    concatenated (L+E, Npad) HBM stream; per-element weights and U tensors are
    VMEM constants; output is a single (eq_total, Npad) lane-dense slab.
    """
    B, C, L = x.shape
    E = y.shape[1]
    N = B * C
    S = L + E

    # Lane tile: multiple of 128 (lane width) AND of C so the channel pattern
    # (lane j -> channel j % C) is identical in every tile.
    unit = math.lcm(128, C)
    TR = unit * max(1, int(tile_n) // unit)
    ntiles = -(-N // TR)
    if ntiles > 1 and ntiles % 2:
        ntiles += 1                 # even split across v7x's 2 TensorCores
    Npad = ntiles * TR
    pad = Npad - N
    reps = TR // C

    # One concatenated stream (single row-blocked DMA per grid step):
    #   rows [0, L):     xt[i, n] = x[n // C, n % C, i]
    #   rows [L, L+E):   yt[e, n] = y[n // C, e]
    xt = x.reshape(N, L).T.astype(jnp.float32)
    yt = jnp.repeat(y.astype(jnp.float32), C, axis=0).T
    stream = jnp.concatenate([xt, yt], axis=0)
    if pad:
        stream = jnp.pad(stream, ((0, 0), (0, pad)))
    stream = stream.astype(stream_dtype)

    args = [stream]
    in_specs = [pl.BlockSpec((S, TR), lambda r: (0, r))]
    stage_meta, eq_info = [], []
    off = 0
    vmem = 2 * S * TR * np.dtype(stream_dtype).itemsize + S * TR * 4
    work = 0
    for p in contractions:
        assert p["L"] == L and p["C"] == C
        eq = p["eqdim"]
        eq_info.append((off, eq))
        off += eq
        metas = []
        rmax = 0
        for st in p["stages"]:
            R, P = st["UT"].shape
            metas.append((R, P, st["m_out"]))
            rmax = max(rmax, R)
            args.append(st["UT"])                                 # (R, P) f32
            in_specs.append(pl.BlockSpec((R, P), lambda r: (0, 0)))
            wlane = jnp.tile(st["W"], (1, 1, reps))               # (E, P, TR)
            args.append(wlane)
            in_specs.append(pl.BlockSpec((E, P, TR), lambda r: (0, 0, 0)))
            vmem += 2 * (R * max(P, 8) * 4 + E * max(P, 8) * TR * 4)
        work = max(work, rmax * TR * 4)
        stage_meta.append(metas)
    eq_total = off
    vmem += 2 * eq_total * TR * 4 + 4 * work
    vmem_limit = int(min(max(2 * vmem, 16 * 1024 * 1024), 64 * 1024 * 1024))

    kernel = _make_kernel(stage_meta, eq_info, L, E)

    out_t = pl.pallas_call(
        kernel,
        out_shape=jax.ShapeDtypeStruct((eq_total, Npad), jnp.float32),
        grid=(ntiles,),
        in_specs=in_specs,
        out_specs=pl.BlockSpec((eq_total, TR), lambda r: (0, r)),
        compiler_params=pltpu.CompilerParams(
            dimension_semantics=("parallel",),
            vmem_limit_bytes=vmem_limit),
    )(*args)

    # Un-pad, transpose back and split into the module's per-irrep layout.
    out2 = out_t[:, :N].T.reshape(B, C, eq_total)
    pieces = [out2[:, :, o:o + e].reshape(B, C * e) for o, e in eq_info]
    return jnp.concatenate(pieces, axis=-1)


# ----------------------------------------------------------------------------
# Pure-JAX reference (exactly the PyTorch einsum strings), for verification
# ----------------------------------------------------------------------------
def contraction_reference(U, W, x, y, correlation, lmax):
    nl = min(lmax, 1)
    mchars = "".join(ALPHABET[: correlation + nl - 1])
    out = jnp.einsum(mchars + "ik,ekc,bci,be->bc" + mchars,
                     U[correlation], W[correlation], x, y, precision=_HIGHEST)
    for nu in range(correlation - 1, 0, -1):
        wc = "".join(ALPHABET[: nu + nl])
        fc = "".join(ALPHABET[: nu - 1 + nl])
        c = jnp.einsum(wc + "k,ekc,be->bc" + wc, U[nu], W[nu], y,
                       precision=_HIGHEST) + out
        out = jnp.einsum("bc" + fc + "i,bci->bc" + fc, c, x,
                         precision=_HIGHEST)
    return out.reshape(out.shape[0], -1)


def symmetric_contraction_reference(x, y, contractions, correlation):
    outs = [contraction_reference(p["U_ref"], p["W"], x, y, correlation,
                                  p["lmax"]) for p in contractions]
    return jnp.concatenate(outs, axis=-1)


# ----------------------------------------------------------------------------
if __name__ == "__main__":
    B, C, E, CORR = 24, 8, 3, 3                # B*C = 192 -> padding + 2 tiles
    irreps_in = [(C, (0, 1)), (C, (1, -1))]    # "8x0e + 8x1o"
    irreps_out = [(1, (0, 1)), (1, (1, -1))]   # "1x0e + 1x1o"

    key = jax.random.PRNGKey(0)
    kx, ky, kw = jax.random.split(key, 3)
    L = _irreps_dim([(1, ir) for _, ir in irreps_in])          # = 4
    x = jax.random.normal(kx, (B, C, L), dtype=jnp.float32)
    y = jax.nn.one_hot(jax.random.randint(ky, (B,), 0, E), E, dtype=jnp.float32)

    contractions, _ = build_symmetric_contraction(kw, irreps_in, irreps_out,
                                                  CORR, E)

    ref = symmetric_contraction_reference(x, y, contractions, CORR)

    # f32 stream path (tile_n=128 exercises row padding and a 2-step grid).
    out = symmetric_contraction_pallas(x, y, contractions, tile_n=128)
    out = jax.block_until_ready(out)
    # Tolerance tightened 10x vs the previous version; with full-precision f32
    # accumulation the observed error is far below this bound.
    np.testing.assert_allclose(np.asarray(out), np.asarray(ref),
                               rtol=5e-3, atol=5e-3)

    # bf16 HBM stream (halves stream traffic on v6e/v7x; f32 in-kernel math).
    out_bf16 = symmetric_contraction_pallas(x, y, contractions, tile_n=128,
                                            stream_dtype=jnp.bfloat16)
    out_bf16 = jax.block_until_ready(out_bf16)
    np.testing.assert_allclose(np.asarray(out_bf16), np.asarray(ref),
                               rtol=5e-2, atol=5e-2)

    print("KERNEL_OK")
</pallas_src>

<mosaic_0001>
module attributes {stable_mosaic.version = 11 : i64} {
  func.func @kernel(%arg0: i32, %arg1: memref<7x128xf32, #tpu.memory_space<vmem>>, %arg2: memref<64x4xf32, #tpu.memory_space<vmem>>, %arg3: memref<3x4x128xf32, #tpu.memory_space<vmem>>, %arg4: memref<16x2xf32, #tpu.memory_space<vmem>>, %arg5: memref<3x2x128xf32, #tpu.memory_space<vmem>>, %arg6: memref<4x1xf32, #tpu.memory_space<vmem>>, %arg7: memref<3x1x128xf32, #tpu.memory_space<vmem>>, %arg8: memref<192x6xf32, #tpu.memory_space<vmem>>, %arg9: memref<3x6x128xf32, #tpu.memory_space<vmem>>, %arg10: memref<48x2xf32, #tpu.memory_space<vmem>>, %arg11: memref<3x2x128xf32, #tpu.memory_space<vmem>>, %arg12: memref<12x1xf32, #tpu.memory_space<vmem>>, %arg13: memref<3x1x128xf32, #tpu.memory_space<vmem>>, %arg14: memref<4x128xf32, #tpu.memory_space<vmem>>) attributes {dimension_semantics = [#tpu.dimension_semantics<parallel>], iteration_bounds = array<i64: 2>, scalar_prefetch = 0 : i64, scratch_operands = 0 : i64, tpu.core_type = #tpu.core_type<tc>, window_params = [{transform_indices = @transform_0, window_bounds = array<i64: 7, 128>}, {pipeline_mode = #tpu.pipeline_mode<synchronous>, transform_indices = @transform_1, window_bounds = array<i64: 64, 4>}, {pipeline_mode = #tpu.pipeline_mode<synchronous>, transform_indices = @transform_2, window_bounds = array<i64: 3, 4, 128>}, {pipeline_mode = #tpu.pipeline_mode<synchronous>, transform_indices = @transform_3, window_bounds = array<i64: 16, 2>}, {pipeline_mode = #tpu.pipeline_mode<synchronous>, transform_indices = @transform_4, window_bounds = array<i64: 3, 2, 128>}, {pipeline_mode = #tpu.pipeline_mode<synchronous>, transform_indices = @transform_5, window_bounds = array<i64: 4, 1>}, {pipeline_mode = #tpu.pipeline_mode<synchronous>, transform_indices = @transform_6, window_bounds = array<i64: 3, 1, 128>}, {pipeline_mode = #tpu.pipeline_mode<synchronous>, transform_indices = @transform_7, window_bounds = array<i64: 192, 6>}, {pipeline_mode = #tpu.pipeline_mode<synchronous>, transform_indices = @transform_8, window_bounds = array<i64: 3, 6, 128>}, {pipeline_mode = #tpu.pipeline_mode<synchronous>, transform_indices = @transform_9, window_bounds = array<i64: 48, 2>}, {pipeline_mode = #tpu.pipeline_mode<synchronous>, transform_indices = @transform_10, window_bounds = array<i64: 3, 2, 128>}, {pipeline_mode = #tpu.pipeline_mode<synchronous>, transform_indices = @transform_11, window_bounds = array<i64: 12, 1>}, {pipeline_mode = #tpu.pipeline_mode<synchronous>, transform_indices = @transform_12, window_bounds = array<i64: 3, 1, 128>}, {transform_indices = @transform_13, window_bounds = array<i64: 4, 128>}]} {
    %c0 = arith.constant 0 : index
    %c0_0 = arith.constant 0 : index
    %0 = vector.load %arg1[%c0, %c0_0] : memref<7x128xf32, #tpu.memory_space<vmem>>, vector<7x128xf32>
    %1 = vector.extract_strided_slice %0 {offsets = [0, 0], sizes = [1, 128], strides = [1, 1]} : vector<7x128xf32> to vector<1x128xf32>
    %2 = vector.extract_strided_slice %0 {offsets = [1, 0], sizes = [1, 128], strides = [1, 1]} : vector<7x128xf32> to vector<1x128xf32>
    %3 = vector.extract_strided_slice %0 {offsets = [2, 0], sizes = [1, 128], strides = [1, 1]} : vector<7x128xf32> to vector<1x128xf32>
    %4 = vector.extract_strided_slice %0 {offsets = [3, 0], sizes = [1, 128], strides = [1, 1]} : vector<7x128xf32> to vector<1x128xf32>
    %5 = vector.extract_strided_slice %0 {offsets = [4, 0], sizes = [1, 128], strides = [1, 1]} : vector<7x128xf32> to vector<1x128xf32>
    %6 = vector.extract_strided_slice %0 {offsets = [5, 0], sizes = [1, 128], strides = [1, 1]} : vector<7x128xf32> to vector<1x128xf32>
    %7 = vector.extract_strided_slice %0 {offsets = [6, 0], sizes = [1, 128], strides = [1, 1]} : vector<7x128xf32> to vector<1x128xf32>
    %c0_1 = arith.constant 0 : index
    %c0_2 = arith.constant 0 : index
    %8 = vector.load %arg2[%c0_1, %c0_2] : memref<64x4xf32, #tpu.memory_space<vmem>>, vector<64x4xf32>
    %c0_3 = arith.constant 0 : index
    %c0_4 = arith.constant 0 : index
    %c0_5 = arith.constant 0 : index
    %9 = vector.load %arg3[%c0_3, %c0_4, %c0_5] : memref<3x4x128xf32, #tpu.memory_space<vmem>>, vector<1x4x128xf32>
    %10 = vector.shape_cast %9 : vector<1x4x128xf32> to vector<4x128xf32>
    %11 = vector.broadcast %5 : vector<1x128xf32> to vector<4x128xf32>
    %12 = arith.mulf %11, %10 : vector<4x128xf32>
    %c1 = arith.constant 1 : index
    %c0_6 = arith.constant 0 : index
    %c0_7 = arith.constant 0 : index
    %13 = vector.load %arg3[%c1, %c0_6, %c0_7] : memref<3x4x128xf32, #tpu.memory_space<vmem>>, vector<1x4x128xf32>
    %14 = vector.shape_cast %13 : vector<1x4x128xf32> to vector<4x128xf32>
    %15 = vector.broadcast %6 : vector<1x128xf32> to vector<4x128xf32>
    %16 = arith.mulf %15, %14 : vector<4x128xf32>
    %17 = arith.addf %12, %16 : vector<4x128xf32>
    %c2 = arith.constant 2 : index
    %c0_8 = arith.constant 0 : index
    %c0_9 = arith.constant 0 : index
    %18 = vector.load %arg3[%c2, %c0_8, %c0_9] : memref<3x4x128xf32, #tpu.memory_space<vmem>>, vector<1x4x128xf32>
    %19 = vector.shape_cast %18 : vector<1x4x128xf32> to vector<4x128xf32>
    %20 = vector.broadcast %7 : vector<1x128xf32> to vector<4x128xf32>
    %21 = arith.mulf %20, %19 : vector<4x128xf32>
    %22 = arith.addf %17, %21 : vector<4x128xf32>
    %cst = arith.constant dense<0.000000e+00> : vector<64x128xf32>
    %23 = tpu.matmul %8, %22, %cst {dimension_numbers = #tpu.dot_dimension_numbers<[1], [0], [0], [1], [0, 0, 1, 1], [], []>} : vector<64x4xf32>, vector<4x128xf32>, vector<64x128xf32> -> vector<64x128xf32>
    %24 = vector.extract_strided_slice %23 {offsets = [0, 0], sizes = [16, 128], strides = [1, 1]} : vector<64x128xf32> to vector<16x128xf32>
    %25 = vector.broadcast %1 : vector<1x128xf32> to vector<16x128xf32>
    %26 = arith.mulf %25, %24 : vector<16x128xf32>
    %27 = vector.extract_strided_slice %23 {offsets = [16, 0], sizes = [16, 128], strides = [1, 1]} : vector<64x128xf32> to vector<16x128xf32>
    %28 = vector.broadcast %2 : vector<1x128xf32> to vector<16x128xf32>
    %29 = arith.mulf %28, %27 : vector<16x128xf32>
    %30 = arith.addf %26, %29 : vector<16x128xf32>
    %31 = vector.extract_strided_slice %23 {offsets = [32, 0], sizes = [16, 128], strides = [1, 1]} : vector<64x128xf32> to vector<16x128xf32>
    %32 = vector.broadcast %3 : vector<1x128xf32> to vector<16x128xf32>
    %33 = arith.mulf %32, %31 : vector<16x128xf32>
    %34 = arith.addf %30, %33 : vector<16x128xf32>
    %35 = vector.extract_strided_slice %23 {offsets = [48, 0], sizes = [16, 128], strides = [1, 1]} : vector<64x128xf32> to vector<16x128xf32>
    %36 = vector.broadcast %4 : vector<1x128xf32> to vector<16x128xf32>
    %37 = arith.mulf %36, %35 : vector<16x128xf32>
    %38 = arith.addf %34, %37 : vector<16x128xf32>
    %c0_10 = arith.constant 0 : index
    %c0_11 = arith.constant 0 : index
    %39 = vector.load %arg4[%c0_10, %c0_11] : memref<16x2xf32, #tpu.memory_space<vmem>>, vector<16x2xf32>
    %c0_12 = arith.constant 0 : index
    %c0_13 = arith.constant 0 : index
    %c0_14 = arith.constant 0 : index
    %40 = vector.load %arg5[%c0_12, %c0_13, %c0_14] : memref<3x2x128xf32, #tpu.memory_space<vmem>>, vector<1x2x128xf32>
    %41 = vector.shape_cast %40 : vector<1x2x128xf32> to vector<2x128xf32>
    %42 = vector.broadcast %5 : vector<1x128xf32> to vector<2x128xf32>
    %43 = arith.mulf %42, %41 : vector<2x128xf32>
    %c1_15 = arith.constant 1 : index
    %c0_16 = arith.constant 0 : index
    %c0_17 = arith.constant 0 : index
    %44 = vector.load %arg5[%c1_15, %c0_16, %c0_17] : memref<3x2x128xf32, #tpu.memory_space<vmem>>, vector<1x2x128xf32>
    %45 = vector.shape_cast %44 : vector<1x2x128xf32> to vector<2x128xf32>
    %46 = vector.broadcast %6 : vector<1x128xf32> to vector<2x128xf32>
    %47 = arith.mulf %46, %45 : vector<2x128xf32>
    %48 = arith.addf %43, %47 : vector<2x128xf32>
    %c2_18 = arith.constant 2 : index
    %c0_19 = arith.constant 0 : index
    %c0_20 = arith.constant 0 : index
    %49 = vector.load %arg5[%c2_18, %c0_19, %c0_20] : memref<3x2x128xf32, #tpu.memory_space<vmem>>, vector<1x2x128xf32>
    %50 = vector.shape_cast %49 : vector<1x2x128xf32> to vector<2x128xf32>
    %51 = vector.broadcast %7 : vector<1x128xf32> to vector<2x128xf32>
    %52 = arith.mulf %51, %50 : vector<2x128xf32>
    %53 = arith.addf %48, %52 : vector<2x128xf32>
    %cst_21 = arith.constant dense<0.000000e+00> : vector<16x128xf32>
    %54 = tpu.matmul %39, %53, %cst_21 {dimension_numbers = #tpu.dot_dimension_numbers<[1], [0], [0], [1], [0, 0, 1, 1], [], []>} : vector<16x2xf32>, vector<2x128xf32>, vector<16x128xf32> -> vector<16x128xf32>
    %55 = arith.addf %54, %38 : vector<16x128xf32>
    %56 = vector.extract_strided_slice %55 {offsets = [0, 0], sizes = [4, 128], strides = [1, 1]} : vector<16x128xf32> to vector<4x128xf32>
    %57 = vector.broadcast %1 : vector<1x128xf32> to vector<4x128xf32>
    %58 = arith.mulf %57, %56 : vector<4x128xf32>
    %59 = vector.extract_strided_slice %55 {offsets = [4, 0], sizes = [4, 128], strides = [1, 1]} : vector<16x128xf32> to vector<4x128xf32>
    %60 = vector.broadcast %2 : vector<1x128xf32> to vector<4x128xf32>
    %61 = arith.mulf %60, %59 : vector<4x128xf32>
    %62 = arith.addf %58, %61 : vector<4x128xf32>
    %63 = vector.extract_strided_slice %55 {offsets = [8, 0], sizes = [4, 128], strides = [1, 1]} : vector<16x128xf32> to vector<4x128xf32>
    %64 = vector.broadcast %3 : vector<1x128xf32> to vector<4x128xf32>
    %65 = arith.mulf %64, %63 : vector<4x128xf32>
    %66 = arith.addf %62, %65 : vector<4x128xf32>
    %67 = vector.extract_strided_slice %55 {offsets = [12, 0], sizes = [4, 128], strides = [1, 1]} : vector<16x128xf32> to vector<4x128xf32>
    %68 = vector.broadcast %4 : vector<1x128xf32> to vector<4x128xf32>
    %69 = arith.mulf %68, %67 : vector<4x128xf32>
    %70 = arith.addf %66, %69 : vector<4x128xf32>
    %c0_22 = arith.constant 0 : index
    %c0_23 = arith.constant 0 : index
    %71 = vector.load %arg6[%c0_22, %c0_23] : memref<4x1xf32, #tpu.memory_space<vmem>>, vector<4x1xf32>
    %c0_24 = arith.constant 0 : index
    %c0_25 = arith.constant 0 : index
    %c0_26 = arith.constant 0 : index
    %72 = vector.load %arg7[%c0_24, %c0_25, %c0_26] : memref<3x1x128xf32, #tpu.memory_space<vmem>>, vector<1x1x128xf32>
    %73 = vector.shape_cast %72 : vector<1x1x128xf32> to vector<1x128xf32>
    %74 = arith.mulf %5, %73 : vector<1x128xf32>
    %c1_27 = arith.constant 1 : index
    %c0_28 = arith.constant 0 : index
    %c0_29 = arith.constant 0 : index
    %75 = vector.load %arg7[%c1_27, %c0_28, %c0_29] : memref<3x1x128xf32, #tpu.memory_space<vmem>>, vector<1x1x128xf32>
    %76 = vector.shape_cast %75 : vector<1x1x128xf32> to vector<1x128xf32>
    %77 = arith.mulf %6, %76 : vector<1x128xf32>
    %78 = arith.addf %74, %77 : vector<1x128xf32>
    %c2_30 = arith.constant 2 : index
    %c0_31 = arith.constant 0 : index
    %c0_32 = arith.constant 0 : index
    %79 = vector.load %arg7[%c2_30, %c0_31, %c0_32] : memref<3x1x128xf32, #tpu.memory_space<vmem>>, vector<1x1x128xf32>
    %80 = vector.shape_cast %79 : vector<1x1x128xf32> to vector<1x128xf32>
    %81 = arith.mulf %7, %80 : vector<1x128xf32>
    %82 = arith.addf %78, %81 : vector<1x128xf32>
    %cst_33 = arith.constant dense<0.000000e+00> : vector<4x128xf32>
    %83 = tpu.matmul %71, %82, %cst_33 {dimension_numbers = #tpu.dot_dimension_numbers<[1], [0], [0], [1], [0, 0, 1, 1], [], []>} : vector<4x1xf32>, vector<1x128xf32>, vector<4x128xf32> -> vector<4x128xf32>
    %84 = arith.addf %83, %70 : vector<4x128xf32>
    %85 = vector.extract_strided_slice %84 {offsets = [0, 0], sizes = [1, 128], strides = [1, 1]} : vector<4x128xf32> to vector<1x128xf32>
    %86 = arith.mulf %1, %85 : vector<1x128xf32>
    %87 = vector.extract_strided_slice %84 {offsets = [1, 0], sizes = [1, 128], strides = [1, 1]} : vector<4x128xf32> to vector<1x128xf32>
    %88 = arith.mulf %2, %87 : vector<1x128xf32>
    %89 = arith.addf %86, %88 : vector<1x128xf32>
    %90 = vector.extract_strided_slice %84 {offsets = [2, 0], sizes = [1, 128], strides = [1, 1]} : vector<4x128xf32> to vector<1x128xf32>
    %91 = arith.mulf %3, %90 : vector<1x128xf32>
    %92 = arith.addf %89, %91 : vector<1x128xf32>
    %93 = vector.extract_strided_slice %84 {offsets = [3, 0], sizes = [1, 128], strides = [1, 1]} : vector<4x128xf32> to vector<1x128xf32>
    %94 = arith.mulf %4, %93 : vector<1x128xf32>
    %95 = arith.addf %92, %94 : vector<1x128xf32>
    %c0_34 = arith.constant 0 : index
    %c0_35 = arith.constant 0 : index
    %96 = vector.load %arg14[%c0_34, %c0_35] : memref<4x128xf32, #tpu.memory_space<vmem>>, vector<1x128xf32>
    tpu.vector_store %arg14[%c0_34, %c0_35], %95 {strides = array<i32>} : memref<4x128xf32, #tpu.memory_space<vmem>>, vector<1x128xf32>,
    %c0_36 = arith.constant 0 : index
    %c0_37 = arith.constant 0 : index
    %97 = vector.load %arg8[%c0_36, %c0_37] : memref<192x6xf32, #tpu.memory_space<vmem>>, vector<192x6xf32>
    %c0_38 = arith.constant 0 : index
    %c0_39 = arith.constant 0 : index
    %c0_40 = arith.constant 0 : index
    %98 = vector.load %arg9[%c0_38, %c0_39, %c0_40] : memref<3x6x128xf32, #tpu.memory_space<vmem>>, vector<1x6x128xf32>
    %99 = vector.shape_cast %98 : vector<1x6x128xf32> to vector<6x128xf32>
    %100 = vector.broadcast %5 : vector<1x128xf32> to vector<6x128xf32>
    %101 = arith.mulf %100, %99 : vector<6x128xf32>
    %c1_41 = arith.constant 1 : index
    %c0_42 = arith.constant 0 : index
    %c0_43 = arith.constant 0 : index
    %102 = vector.load %arg9[%c1_41, %c0_42, %c0_43] : memref<3x6x128xf32, #tpu.memory_space<vmem>>, vector<1x6x128xf32>
    %103 = vector.shape_cast %102 : vector<1x6x128xf32> to vector<6x128xf32>
    %104 = vector.broadcast %6 : vector<1x128xf32> to vector<6x128xf32>
    %105 = arith.mulf %104, %103 : vector<6x128xf32>
    %106 = arith.addf %101, %105 : vector<6x128xf32>
    %c2_44 = arith.constant 2 : index
    %c0_45 = arith.constant 0 : index
    %c0_46 = arith.constant 0 : index
    %107 = vector.load %arg9[%c2_44, %c0_45, %c0_46] : memref<3x6x128xf32, #tpu.memory_space<vmem>>, vector<1x6x128xf32>
    %108 = vector.shape_cast %107 : vector<1x6x128xf32> to vector<6x128xf32>
    %109 = vector.broadcast %7 : vector<1x128xf32> to vector<6x128xf32>
    %110 = arith.mulf %109, %108 : vector<6x128xf32>
    %111 = arith.addf %106, %110 : vector<6x128xf32>
    %cst_47 = arith.constant dense<0.000000e+00> : vector<192x128xf32>
    %112 = tpu.matmul %97, %111, %cst_47 {dimension_numbers = #tpu.dot_dimension_numbers<[1], [0], [0], [1], [0, 0, 1, 1], [], []>} : vector<192x6xf32>, vector<6x128xf32>, vector<192x128xf32> -> vector<192x128xf32>
    %113 = vector.extract_strided_slice %112 {offsets = [0, 0], sizes = [48, 128], strides = [1, 1]} : vector<192x128xf32> to vector<48x128xf32>
    %114 = vector.broadcast %1 : vector<1x128xf32> to vector<48x128xf32>
    %115 = arith.mulf %114, %113 : vector<48x128xf32>
    %116 = vector.extract_strided_slice %112 {offsets = [48, 0], sizes = [48, 128], strides = [1, 1]} : vector<192x128xf32> to vector<48x128xf32>
    %117 = vector.broadcast %2 : vector<1x128xf32> to vector<48x128xf32>
    %118 = arith.mulf %117, %116 : vector<48x128xf32>
    %119 = arith.addf %115, %118 : vector<48x128xf32>
    %120 = vector.extract_strided_slice %112 {offsets = [96, 0], sizes = [48, 128], strides = [1, 1]} : vector<192x128xf32> to vector<48x128xf32>
    %121 = vector.broadcast %3 : vector<1x128xf32> to vector<48x128xf32>
    %122 = arith.mulf %121, %120 : vector<48x128xf32>
    %123 = arith.addf %119, %122 : vector<48x128xf32>
    %124 = vector.extract_strided_slice %112 {offsets = [144, 0], sizes = [48, 128], strides = [1, 1]} : vector<192x128xf32> to vector<48x128xf32>
    %125 = vector.broadcast %4 : vector<1x128xf32> to vector<48x128xf32>
    %126 = arith.mulf %125, %124 : vector<48x128xf32>
    %127 = arith.addf %123, %126 : vector<48x128xf32>
    %c0_48 = arith.constant 0 : index
    %c0_49 = arith.constant 0 : index
    %128 = vector.load %arg10[%c0_48, %c0_49] : memref<48x2xf32, #tpu.memory_space<vmem>>, vector<48x2xf32>
    %c0_50 = arith.constant 0 : index
    %c0_51 = arith.constant 0 : index
    %c0_52 = arith.constant 0 : index
    %129 = vector.load %arg11[%c0_50, %c0_51, %c0_52] : memref<3x2x128xf32, #tpu.memory_space<vmem>>, vector<1x2x128xf32>
    %130 = vector.shape_cast %129 : vector<1x2x128xf32> to vector<2x128xf32>
    %131 = vector.broadcast %5 : vector<1x128xf32> to vector<2x128xf32>
    %132 = arith.mulf %131, %130 : vector<2x128xf32>
    %c1_53 = arith.constant 1 : index
    %c0_54 = arith.constant 0 : index
    %c0_55 = arith.constant 0 : index
    %133 = vector.load %arg11[%c1_53, %c0_54, %c0_55] : memref<3x2x128xf32, #tpu.memory_space<vmem>>, vector<1x2x128xf32>
    %134 = vector.shape_cast %133 : vector<1x2x128xf32> to vector<2x128xf32>
    %135 = vector.broadcast %6 : vector<1x128xf32> to vector<2x128xf32>
    %136 = arith.mulf %135, %134 : vector<2x128xf32>
    %137 = arith.addf %132, %136 : vector<2x128xf32>
    %c2_56 = arith.constant 2 : index
    %c0_57 = arith.constant 0 : index
    %c0_58 = arith.constant 0 : index
    %138 = vector.load %arg11[%c2_56, %c0_57, %c0_58] : memref<3x2x128xf32, #tpu.memory_space<vmem>>, vector<1x2x128xf32>
    %139 = vector.shape_cast %138 : vector<1x2x128xf32> to vector<2x128xf32>
    %140 = vector.broadcast %7 : vector<1x128xf32> to vector<2x128xf32>
    %141 = arith.mulf %140, %139 : vector<2x128xf32>
    %142 = arith.addf %137, %141 : vector<2x128xf32>
    %cst_59 = arith.constant dense<0.000000e+00> : vector<48x128xf32>
    %143 = tpu.matmul %128, %142, %cst_59 {dimension_numbers = #tpu.dot_dimension_numbers<[1], [0], [0], [1], [0, 0, 1, 1], [], []>} : vector<48x2xf32>, vector<2x128xf32>, vector<48x128xf32> -> vector<48x128xf32>
    %144 = arith.addf %143, %127 : vector<48x128xf32>
    %145 = vector.extract_strided_slice %144 {offsets = [0, 0], sizes = [12, 128], strides = [1, 1]} : vector<48x128xf32> to vector<12x128xf32>
    %146 = vector.broadcast %1 : vector<1x128xf32> to vector<12x128xf32>
    %147 = arith.mulf %146, %145 : vector<12x128xf32>
    %148 = vector.extract_strided_slice %144 {offsets = [12, 0], sizes = [12, 128], strides = [1, 1]} : vector<48x128xf32> to vector<12x128xf32>
    %149 = vector.broadcast %2 : vector<1x128xf32> to vector<12x128xf32>
    %150 = arith.mulf %149, %148 : vector<12x128xf32>
    %151 = arith.addf %147, %150 : vector<12x128xf32>
    %152 = vector.extract_strided_slice %144 {offsets = [24, 0], sizes = [12, 128], strides = [1, 1]} : vector<48x128xf32> to vector<12x128xf32>
    %153 = vector.broadcast %3 : vector<1x128xf32> to vector<12x128xf32>
    %154 = arith.mulf %153, %152 : vector<12x128xf32>
    %155 = arith.addf %151, %154 : vector<12x128xf32>
    %156 = vector.extract_strided_slice %144 {offsets = [36, 0], sizes = [12, 128], strides = [1, 1]} : vector<48x128xf32> to vector<12x128xf32>
    %157 = vector.broadcast %4 : vector<1x128xf32> to vector<12x128xf32>
    %158 = arith.mulf %157, %156 : vector<12x128xf32>
    %159 = arith.addf %155, %158 : vector<12x128xf32>
    %c0_60 = arith.constant 0 : index
    %c0_61 = arith.constant 0 : index
    %160 = vector.load %arg12[%c0_60, %c0_61] : memref<12x1xf32, #tpu.memory_space<vmem>>, vector<12x1xf32>
    %c0_62 = arith.constant 0 : index
    %c0_63 = arith.constant 0 : index
    %c0_64 = arith.constant 0 : index
    %161 = vector.load %arg13[%c0_62, %c0_63, %c0_64] : memref<3x1x128xf32, #tpu.memory_space<vmem>>, vector<1x1x128xf32>
    %162 = vector.shape_cast %161 : vector<1x1x128xf32> to vector<1x128xf32>
    %163 = arith.mulf %5, %162 : vector<1x128xf32>
    %c1_65 = arith.constant 1 : index
    %c0_66 = arith.constant 0 : index
    %c0_67 = arith.constant 0 : index
    %164 = vector.load %arg13[%c1_65, %c0_66, %c0_67] : memref<3x1x128xf32, #tpu.memory_space<vmem>>, vector<1x1x128xf32>
    %165 = vector.shape_cast %164 : vector<1x1x128xf32> to vector<1x128xf32>
    %166 = arith.mulf %6, %165 : vector<1x128xf32>
    %167 = arith.addf %163, %166 : vector<1x128xf32>
    %c2_68 = arith.constant 2 : index
    %c0_69 = arith.constant 0 : index
    %c0_70 = arith.constant 0 : index
    %168 = vector.load %arg13[%c2_68, %c0_69, %c0_70] : memref<3x1x128xf32, #tpu.memory_space<vmem>>, vector<1x1x128xf32>
    %169 = vector.shape_cast %168 : vector<1x1x128xf32> to vector<1x128xf32>
    %170 = arith.mulf %7, %169 : vector<1x128xf32>
    %171 = arith.addf %167, %170 : vector<1x128xf32>
    %cst_71 = arith.constant dense<0.000000e+00> : vector<12x128xf32>
    %172 = tpu.matmul %160, %171, %cst_71 {dimension_numbers = #tpu.dot_dimension_numbers<[1], [0], [0], [1], [0, 0, 1, 1], [], []>} : vector<12x1xf32>, vector<1x128xf32>, vector<12x128xf32> -> vector<12x128xf32>
    %173 = arith.addf %172, %159 : vector<12x128xf32>
    %174 = vector.extract_strided_slice %173 {offsets = [0, 0], sizes = [3, 128], strides = [1, 1]} : vector<12x128xf32> to vector<3x128xf32>
    %175 = vector.broadcast %1 : vector<1x128xf32> to vector<3x128xf32>
    %176 = arith.mulf %175, %174 : vector<3x128xf32>
    %177 = vector.extract_strided_slice %173 {offsets = [3, 0], sizes = [3, 128], strides = [1, 1]} : vector<12x128xf32> to vector<3x128xf32>
    %178 = vector.broadcast %2 : vector<1x128xf32> to vector<3x128xf32>
    %179 = arith.mulf %178, %177 : vector<3x128xf32>
    %180 = arith.addf %176, %179 : vector<3x128xf32>
    %181 = vector.extract_strided_slice %173 {offsets = [6, 0], sizes = [3, 128], strides = [1, 1]} : vector<12x128xf32> to vector<3x128xf32>
    %182 = vector.broadcast %3 : vector<1x128xf32> to vector<3x128xf32>
    %183 = arith.mulf %182, %181 : vector<3x128xf32>
    %184 = arith.addf %180, %183 : vector<3x128xf32>
    %185 = vector.extract_strided_slice %173 {offsets = [9, 0], sizes = [3, 128], strides = [1, 1]} : vector<12x128xf32> to vector<3x128xf32>
    %186 = vector.broadcast %4 : vector<1x128xf32> to vector<3x128xf32>
    %187 = arith.mulf %186, %185 : vector<3x128xf32>
    %188 = arith.addf %184, %187 : vector<3x128xf32>
    %c1_72 = arith.constant 1 : index
    %c0_73 = arith.constant 0 : index
    %189 = vector.load %arg14[%c1_72, %c0_73] : memref<4x128xf32, #tpu.memory_space<vmem>>, vector<3x128xf32>
    tpu.vector_store %arg14[%c1_72, %c0_73], %188 {strides = array<i32>} : memref<4x128xf32, #tpu.memory_space<vmem>>, vector<3x128xf32>,
    return
  }
  func.func @transform_0(%arg0: i32) -> (i32, i32) {
    %c0_i32 = arith.constant 0 : i32
    %c0_i32_0 = arith.constant 0 : i32
    return %c0_i32, %arg0 : i32, i32
  }
  func.func @transform_1(%arg0: i32) -> (i32, i32) {
    %c0_i32 = arith.constant 0 : i32
    %c0_i32_0 = arith.constant 0 : i32
    %c0_i32_1 = arith.constant 0 : i32
    return %c0_i32, %c0_i32_0 : i32, i32
  }
  func.func @transform_2(%arg0: i32) -> (i32, i32, i32) {
    %c0_i32 = arith.constant 0 : i32
    %c0_i32_0 = arith.constant 0 : i32
    %c0_i32_1 = arith.constant 0 : i32
    %c0_i32_2 = arith.constant 0 : i32
    return %c0_i32, %c0_i32_0, %c0_i32_1 : i32, i32, i32
  }
  func.func @transform_3(%arg0: i32) -> (i32, i32) {
    %c0_i32 = arith.constant 0 : i32
    %c0_i32_0 = arith.constant 0 : i32
    %c0_i32_1 = arith.constant 0 : i32
    return %c0_i32, %c0_i32_0 : i32, i32
  }
  func.func @transform_4(%arg0: i32) -> (i32, i32, i32) {
    %c0_i32 = arith.constant 0 : i32
    %c0_i32_0 = arith.constant 0 : i32
    %c0_i32_1 = arith.constant 0 : i32
    %c0_i32_2 = arith.constant 0 : i32
    return %c0_i32, %c0_i32_0, %c0_i32_1 : i32, i32, i32
  }
  func.func @transform_5(%arg0: i32) -> (i32, i32) {
    %c0_i32 = arith.constant 0 : i32
    %c0_i32_0 = arith.constant 0 : i32
    %c0_i32_1 = arith.constant 0 : i32
    return %c0_i32, %c0_i32_0 : i32, i32
  }
  func.func @transform_6(%arg0: i32) -> (i32, i32, i32) {
    %c0_i32 = arith.constant 0 : i32
    %c0_i32_0 = arith.constant 0 : i32
    %c0_i32_1 = arith.constant 0 : i32
    %c0_i32_2 = arith.constant 0 : i32
    return %c0_i32, %c0_i32_0, %c0_i32_1 : i32, i32, i32
  }
  func.func @transform_7(%arg0: i32) -> (i32, i32) {
    %c0_i32 = arith.constant 0 : i32
    %c0_i32_0 = arith.constant 0 : i32
    %c0_i32_1 = arith.constant 0 : i32
    return %c0_i32, %c0_i32_0 : i32, i32
  }
  func.func @transform_8(%arg0: i32) -> (i32, i32, i32) {
    %c0_i32 = arith.constant 0 : i32
    %c0_i32_0 = arith.constant 0 : i32
    %c0_i32_1 = arith.constant 0 : i32
    %c0_i32_2 = arith.constant 0 : i32
    return %c0_i32, %c0_i32_0, %c0_i32_1 : i32, i32, i32
  }
  func.func @transform_9(%arg0: i32) -> (i32, i32) {
    %c0_i32 = arith.constant 0 : i32
    %c0_i32_0 = arith.constant 0 : i32
    %c0_i32_1 = arith.constant 0 : i32
    return %c0_i32, %c0_i32_0 : i32, i32
  }
  func.func @transform_10(%arg0: i32) -> (i32, i32, i32) {
    %c0_i32 = arith.constant 0 : i32
    %c0_i32_0 = arith.constant 0 : i32
    %c0_i32_1 = arith.constant 0 : i32
    %c0_i32_2 = arith.constant 0 : i32
    return %c0_i32, %c0_i32_0, %c0_i32_1 : i32, i32, i32
  }
  func.func @transform_11(%arg0: i32) -> (i32, i32) {
    %c0_i32 = arith.constant 0 : i32
    %c0_i32_0 = arith.constant 0 : i32
    %c0_i32_1 = arith.constant 0 : i32
    return %c0_i32, %c0_i32_0 : i32, i32
  }
  func.func @transform_12(%arg0: i32) -> (i32, i32, i32) {
    %c0_i32 = arith.constant 0 : i32
    %c0_i32_0 = arith.constant 0 : i32
    %c0_i32_1 = arith.constant 0 : i32
    %c0_i32_2 = arith.constant 0 : i32
    return %c0_i32, %c0_i32_0, %c0_i32_1 : i32, i32, i32
  }
  func.func @transform_13(%arg0: i32) -> (i32, i32) {
    %c0_i32 = arith.constant 0 : i32
    %c0_i32_0 = arith.constant 0 : i32
    return %c0_i32, %arg0 : i32, i32
  }
}

</mosaic_0001>

<bundles_post_ra>
// kernel: tpu_custom_call.1
= control target key start
LH: loop header
LB: loop body
LE: loop exit
PB: predicated region body
PF: predicated region fallthrough
CT: control target
= control target key end

     0   :  { %18 = vsyncpa [#allocation3], 0  ;;  %s2383_s0 = inlined_call_operand.vmem [shape: f32[7,256], index: 0, kind: input, shape index: {}]   ;;  %s2384_s1 = inlined_call_operand.vmem [shape: f32[64,4], index: 1, kind: input, shape index: {}]   ;;  %s2385_s2 = inlined_call_operand.vmem [shape: f32[3,4,128], index: 2, kind: input, shape index: {}]   ;;  %s2386_s3 = inlined_call_operand.vmem [shape: f32[16,2], index: 3, kind: input, shape index: {}]   ;;  %s2387_s4 = inlined_call_operand.vmem [shape: f32[3,2,128], index: 4, kind: input, shape index: {}]   ;;  %s2388_s5 = inlined_call_operand.vmem [shape: f32[4,1], index: 5, kind: input, shape index: {}]   ;;  %s2389_s6 = inlined_call_operand.vmem [shape: f32[3,1,128], index: 6, kind: input, shape index: {}]   ;;  %s2390_s7 = inlined_call_operand.vmem [shape: f32[192,6], index: 7, kind: input, shape index: {}]   ;;  %s2391_s8 = inlined_call_operand.vmem [shape: f32[3,6,128], index: 8, kind: input, shape index: {}]   ;;  %s2392_s9 = inlined_call_operand.vmem [shape: f32[48,2], index: 9, kind: input, shape index: {}]   ;;  %s2393_s10 = inlined_call_operand.vmem [shape: f32[3,2,128], index: 10, kind: input, shape index: {}]   ;;  %s2394_s11 = inlined_call_operand.vmem [shape: f32[12,1], index: 11, kind: input, shape index: {}]   ;;  %s2395_s12 = inlined_call_operand.vmem [shape: f32[3,1,128], index: 12, kind: input, shape index: {}]   ;;  %s2396_s13 = inlined_call_operand.hbm [shape: f32[4,256], index: 13, kind: output, shape index: {}]  }
   0x1   :  { %20 = vsyncpa [#allocation3 + $0x1], 0  ;;  %s1963_s25 = smov 0   ;;  %s1965_s26 = smov 0  }
   0x2   :  { %s1967_s27 = smov 0   ;;  %s1969_s28 = smov 0  }
   0x3 LB: > { %2401 = sst [smem:[#allocation5_spill]] %s1884_s27  ;;  %s1984_s29 = sadd.s32 4294967295, %s1888_s28   ;;  %s1888_s28 = sphi %s1969_s28, %s2408_s28   ;;  %s1884_s27 = sphi %s1967_s27, %s2410_s27   ;;  %s1880_s26 = sphi %s1965_s26, %s2412_s26   ;;  %s1876_s25 = sphi %s1963_s25, %s2411_s25  }
   0x4   : > { %s1581_s30 = sadd.s32 4294967294, %s1888_s28   ;;  %s1988_s14 = sadd.s32 1, %s1888_s28  }
   0x5   : > { %2402 = sst [smem:[#allocation6_spill]] %s1988_s14  ;;  %s311_s15 = sadd.s32 1, %s1884_s27 }
   0x6   : > { %s308_s16 = ssub.s32 %s1888_s28, %s1988_s14  ;;  %p321_p0 = scmp.ne.s32.totalorder %s1884_s27, %s1880_s26 }
   0x7   : > { %p309_p1 = scmp.eq.s32.totalorder %s308_s16, 0  ;;  %p322_p2 = scmp.eq.s32.totalorder %s1984_s29, 1 }
   0x8   : > { %p327_p3 = scmp.ne.s32.totalorder %s1880_s26, %s1876_s25  ;;  %p328_p4 = scmp.eq.s32.totalorder %s1581_s30, 1 }
   0x9   : > { %s1999_s17 = scalar_select %p309_p1, %s1884_s27, %s311_s15  }
   0xa   : > { %p2001_p5 = por %p322_p2, %p321_p0  ;;  %p2005_p6 = por %p328_p4, %p327_p3 }
   0xb   : > { %2403 = sst [smem:[#allocation7_spill]] %s1999_s17  ;;  %p1584_p7 = scmp.ge.s32.totalorder %s1888_s28, 1 }
   0xc   : > { %s2405_s19 = scalar_select %p2005_p6, 1, 0 }
   0xd   : > { %p389_p8 = scmp.lt.s32.totalorder %s1888_s28, 3 }
   0xe   : > { %2406 = sst [smem:[#allocation8_spill]] %s2405_s19 }
   0xf   : > { %p390_p9 = pnand %p1584_p7, %p389_p8 }
  0x10   : > { %p432_p10 = scmp.lt.s32.totalorder (!%p390_p9), %s1984_s29, 1  ;;  %s429_s27 = sand.u32 (!%p390_p9), 1, %s1880_s26  }
  0x11   : > { %393 = sbr.rel (%p390_p9) target bundleno = 312 (0x138), region = 72  ;;  %s1585_s17 = sshll.u32 (!%p390_p9), %s429_s27, 2 }
  0x12   : > { %s2326_s21 = scalar_lea.vmem (!%p390_p9), [#allocation2], %s1585_s17  ;;  %s1509_s14 = scalar_lea.sflag (!%p390_p9), [#allocation3], %s429_s27 }
  0x13   : > { %s1892_s15 = smov (!%p390_p9), [#allocation2]  }
  0x14   : > { %s1832_s16 = sshll.u32 (!%p390_p9), %s1892_s15, 4  ;;  %s1833_s16 = int_to_ptr.vmem [resolvable:$false] %s1832_s16 }
  0x16   : > { %v446_v0 = vlaneseq  ;;  %s433_s20 = scalar_select %p432_p10, %s1984_s29, 1  ;;  %v437_v2 = vld [vmem:[%s2384_s1] sm:$0xff]  ;;  %vm467_vm0 = vcmask 31744   ;;  %vm643_vm1 = vcmask 15360   ;;  %v1588_v13 = vld [vmem:[%s2385_s2 + $0x8] sm:$0xf] }
  0x17   : > { %v631_v3 = vld [vmem:[%s2386_s3] sm:$0xff]  ;;  %1709 = vmatprep.mubr.msk.f32.mxu0 %vm467_vm0, %v437_v2  ;;  %v1610_v24 = vld [vmem:[%s2391_s8 + $0x8] sm:$0x3f]  ;;  %v1611_v29 = vld [vmem:[%s2391_s8 + $0x10] sm:$0x3f]  ;;  %vm492_vm2 = vcmask 1043456  }
  0x18   : > { %v2013_v1 = vshrl.u32 %v446_v0, 7  ;;  %s1586_s30 = sshll.u32 %s433_s20, 3  ;;  %v445_v4 = vld [vmem:[%s2385_s2] sm:$0xf]  ;;  %v1587_v6 = vld [vmem:[%s2385_s2 + $0x4] sm:$0xf]  ;;  %1723 = vmatprep.mubr.msk.f32.mxu1 %vm643_vm1, %v631_v3 }
  0x19   : > { %s435_s22 = scalar_lea.vmem %s2383_s0, %s1586_s30  ;;  %v1603_v9 = vld [vmem:[%s2389_s6] ss:$0 sm:$0xff]  ;;  %v1605_v10 = vld [vmem:[%s2389_s6 + $0x1] ss:$0 sm:$0xff]  ;;  %v1607_v11 = vld [vmem:[%s2389_s6 + $0x2] ss:$0 sm:$0xff] }
  0x1a   : > { %v448_v5 = vsub.s32 4, %v2013_v1  ;;  %v455_v7 = vsub.s32 5, %v2013_v1  ;;  %v463_v8 = vsub.s32 6, %v2013_v1  ;;  %v2044_v12 = vld [vmem:[%s435_s22] sm:$0x7f]  ;;  %vm650_vm3 = vcmask 1041408  }
  0x1b   : > { %v633_v14 = vld [vmem:[%s2387_s4] sm:$0x3]  ;;  %v1598_v18 = vld [vmem:[%s2387_s4 + $0x2] sm:$0x3]  ;;  %v1599_v19 = vld [vmem:[%s2387_s4 + $0x4] sm:$0x3]  ;;  %v750_v20 = vmul.f32 %v1603_v9, %v2044_v12  ;;  %v759_v21 = vmul.f32 %v1605_v10, %v2044_v12  ;;  %v772_v22 = vmul.f32 %v1607_v11, %v2044_v12 }
  0x1c   : > { %v449_v15 = vrot.slane %v2044_v12, %v448_v5  ;;  %v456_v16 = vrot.slane %v2044_v12, %v455_v7  ;;  %v464_v17 = vrot.slane %v2044_v12, %v463_v8  ;;  %v892_v23 = vld [vmem:[%s2391_s8] sm:$0x3f]  ;;  %v438_v43 = vld [vmem:[%s2384_s1 + $0x8] sm:$0xff]  ;;  %vm783_vm4 = vcmask 1040384   ;;  %v439_v51 = vld [vmem:[%s2384_s1 + $0x10] sm:$0xff]  ;;  %s1655_s30 = sshll.u32 %s1984_s29, 6 }
  0x1d   : > { %v761_v32 = vrot.slane %v759_v21, 1  ;;  %v774_v33 = vrot.slane %v772_v22, 2  ;;  %v632_v44 = vld [vmem:[%s2386_s3 + $0x8] sm:$0xff]  ;;  %v1212_v46 = vld [vmem:[%s2393_s10] sm:$0x3]  ;;  %vm975_vm5 = vcmask 1045504   ;;  %s1520_s24 = scalar_lea.hbm %s2396_s13, %s1655_s30 }
  0x1e   : > { %v450_v25 = vmul.f32 %v449_v15, %v445_v4  ;;  %v457_v26 = vmul.f32 %v1587_v6, %v456_v16  ;;  %v465_v27 = vmul.f32 %v1588_v13, %v464_v17  ;;  %v634_v28 = vmul.f32 %v633_v14, %v449_v15  ;;  %v1637_v48 = vld [vmem:[%s2393_s10 + $0x2] sm:$0x3]  ;;  %v1638_v49 = vld [vmem:[%s2393_s10 + $0x4] sm:$0x3]  ;;  %v440_v56 = vld [vmem:[%s2384_s1 + $0x18] sm:$0xff]  ;;  %s1522_s20 = sshll.u32 %s2326_s21, 4  ;;  %s1523_s20 = int_to_ptr.vmem [resolvable:$true] %s1522_s20 }
  0x1f   : > { %v637_v30 = vmul.f32 %v1598_v18, %v456_v16  ;;  %v641_v31 = vmul.f32 %v1599_v19, %v464_v17  ;;  %v893_v35 = vmul.f32 %v892_v23, %v449_v15  ;;  %v896_v36 = vmul.f32 %v1610_v24, %v456_v16  ;;  %v742_v58 = vld [vmem:[%s2388_s5] sm:$0xf]  ;;  %v874_v61 = vld [vmem:[%s2390_s7 + $0x30] sm:$0xff]  ;;  %v442_v5 = vld [vmem:[%s2384_s1 + $0x28] sm:$0xff]  ;;  %s1828_s19 = scalar_lea.vmem %s1523_s20, 64  ;;  %s1834_s29 = scalar_lea.vmem %s1833_s16, 128 }
  0x20   : > { %v458_v34 = vadd.f32 %v457_v26, %v450_v25  ;;  %v763_v38 = vadd.f32 %v761_v32, %v750_v20  ;;  %v900_v39 = vmul.f32 %v1611_v29, %v464_v17  ;;  %v1213_v47 = vmul.f32 %v1212_v46, %v449_v15  ;;  %v441_v59 = vld [vmem:[%s2384_s1 + $0x20] sm:$0xff]  ;;  %v875_v6 = vld [vmem:[%s2390_s7 + $0x38] sm:$0xff]  ;;  %v443_v7 = vld [vmem:[%s2384_s1 + $0x30] sm:$0xff]  ;;  %p1829_p11 = scmp.ne.s32.totalorder %s1523_s20, %s1828_s19  ;;  %p1835_p0 = scmp.lt.s32.totalorder %s1523_s20, %s1833_s16 }
  0x21   : > { %v638_v37 = vadd.f32 %v637_v30, %v634_v28  ;;  %v897_v41 = vadd.f32 %v896_v36, %v893_v35  ;;  %v1216_v53 = vmul.f32 %v1637_v48, %v456_v16  ;;  %v1220_v54 = vmul.f32 %v1638_v49, %v464_v17  ;;  %v1646_v60 = vld [vmem:[%s2395_s12] ss:$0 sm:$0xff]  ;;  %v1648_v63 = vld [vmem:[%s2395_s12 + $0x1] ss:$0 sm:$0xff]  ;;  %v1650_v0 = vld [vmem:[%s2395_s12 + $0x2] ss:$0 sm:$0xff]  ;;  %p1836_p1 = scmp.lt.s32.totalorder %s1834_s29, %s1828_s19 }
  0x22   : > { %v466_v40 = vadd.f32 %v465_v27, %v458_v34  ;;  %v776_v45 = vadd.f32 %v774_v33, %v763_v38  ;;  %v1890_v55 = vmov 0.0   ;;  %vm779_vm6 = vcmask 7168   ;;  %v876_v9 = vld [vmem:[%s2390_s7 + $0x40] sm:$0xff]  ;;  %v444_v13 = vld [vmem:[%s2384_s1 + $0x38] sm:$0xff]  ;;  %v877_v14 = vld [vmem:[%s2390_s7 + $0x48] sm:$0xff]  ;;  %p1830_p12 = pnand %p1829_p11, %p2001_p5 }
  0x23   : > { %v642_v42 = vadd.f32 %v641_v31, %v638_v37  ;;  %v901_v52 = vadd.f32 %v900_v39, %v897_v41  ;;  %v1217_v57 = vadd.f32 %v1216_v53, %v1213_v47  ;;  %vm1891_vm7 = vmmov 0   ;;  %v868_v15 = vld [vmem:[%s2390_s7] sm:$0xff]  ;;  %v878_v16 = vld [vmem:[%s2390_s7 + $0x50] sm:$0xff]  ;;  %v869_v18 = vld [vmem:[%s2390_s7 + $0x8] sm:$0xff]  ;;  %p1837_p2 = por %p1836_p1, %p1835_p0 }
  0x24   : > { %1707 = vmatprep.subr.msk.mxu0 %vm492_vm2, %v466_v40  ;;  %v778_v50 = vrot.slane %v776_v45, 4  ;;  %vm902_vm8 = vcmask 48128   ;;  %v1375_v2 = vmul.f32 %v1646_v60, %v2044_v12  ;;  %v1384_v3 = vmul.f32 %v1648_v63, %v2044_v12  ;;  %v879_v19 = vld [vmem:[%s2390_s7 + $0x58] sm:$0xff]  ;;  %v870_v20 = vld [vmem:[%s2390_s7 + $0x10] sm:$0xff]  ;;  %v880_v21 = vld [vmem:[%s2390_s7 + $0x60] sm:$0xff]  ;;  %p1831_p13 = pneg %p1830_p12 }
  0x25   : > { %1721 = vmatprep.subr.msk.mxu1 %vm650_vm3, %v642_v42  ;;  %1708 = vmatpush3.msk.msra.mxu0 %vm492_vm2, %v466_v40  ;;  %v1221_v62 = vadd.f32 %v1220_v54, %v1217_v57  ;;  %v1397_v4 = vmul.f32 %v1650_v0, %v2044_v12  ;;  %v871_v23 = vld [vmem:[%s2390_s7 + $0x18] sm:$0xff]  ;;  %v881_v24 = vld [vmem:[%s2390_s7 + $0x68] sm:$0xff]  ;;  %v872_v25 = vld [vmem:[%s2390_s7 + $0x20] sm:$0xff]  ;;  %v603_v45 = vsub.s32 0, %v2013_v1  ;;  %v609_v46 = vsub.s32 1, %v2013_v1 }
  0x26   : > { %1722 = vmatpush3.msk.msra.mxu1 %vm650_vm3, %v642_v42  ;;  %1710 = vmatmul.mubr.msk.f32.vlgmr.msra.gmra.mxu0 %vm467_vm0, %v438_v43  ;;  %v1386_v8 = vrot.slane %v1384_v3, 1  ;;  %v882_v26 = vld [vmem:[%s2390_s7 + $0x70] sm:$0xff]  ;;  %v873_v27 = vld [vmem:[%s2390_s7 + $0x28] sm:$0xff]  ;;  %v883_v28 = vld [vmem:[%s2390_s7 + $0x78] sm:$0xff]  ;;  %p1838_p3 = pnand %p1837_p2, %p1831_p13 }
  0x27   : > { %1724 = vmatmul.mubr.msk.f32.vlgmr.msra.gmra.mxu1 %vm643_vm1, %v632_v44  ;;  %1726 = vmatprep.subr.mxu1 %v1890_v55  ;;  %v1399_v10 = vrot.slane %v1397_v4, 2  ;;  %v1206_v29 = vld [vmem:[%s2392_s9] sm:$0xff]  ;;  %v1207_v31 = vld [vmem:[%s2392_s9 + $0x8] sm:$0xff]  ;;  %v1208_v33 = vld [vmem:[%s2392_s9 + $0x10] sm:$0xff]  ;;  %v2274_v47 = vrot.slane %v2044_v12, %v603_v45 }
  0x28   : > { %1727 = vmatpush3.msk.msra.mxu1 %vm783_vm4, %v778_v50  ;;  %1712 = vmatprep.mubr.msk.f32.mxu0 %vm467_vm0, %v439_v51  ;;  %v1388_v11 = vadd.f32 %v1386_v8, %v1375_v2  ;;  %v884_v30 = vld [vmem:[%s2390_s7 + $0x80] sm:$0xff]  ;;  %v885_v32 = vld [vmem:[%s2390_s7 + $0x88] sm:$0xff]  ;;  %v886_v34 = vld [vmem:[%s2390_s7 + $0x90] sm:$0xff]  ;;  %v2277_v50 = vrot.slane %v2044_v12, %v609_v46  ;;  %v617_v51 = vsub.s32 2, %v2013_v1 }
  0x29   : > { %1728 = vmatprep.mubr.msk.f32.mxu1 %vm1891_vm7, %v1890_v55  ;;  %1785 = vmatprep.subr.msk.mxu1 %vm975_vm5, %v901_v52  ;;  %v1209_v35 = vld [vmem:[%s2392_s9 + $0x18] sm:$0xff]  ;;  %v1210_v37 = vld [vmem:[%s2392_s9 + $0x20] sm:$0xff]  ;;  %v1211_v39 = vld [vmem:[%s2392_s9 + $0x28] sm:$0xff] }
  0x2a   : > { %1713 = vmatmul.mubr.msk.f32.gmra.mxu0 %vm467_vm0, %v440_v56  ;;  %1731 = vmatprep.subr.msk.mxu0 %vm975_vm5, %v901_v52  ;;  %v1401_v17 = vadd.f32 %v1399_v10, %v1388_v11  ;;  %v887_v36 = vld [vmem:[%s2390_s7 + $0x98] sm:$0xff]  ;;  %v888_v38 = vld [vmem:[%s2390_s7 + $0xa0] sm:$0xff]  ;;  %v889_v40 = vld [vmem:[%s2390_s7 + $0xa8] sm:$0xff] }
  0x2b   : > { %1729 = vmatmul.mubr.msk.f32.vlgmr.msra.gmra.mxu1 %vm779_vm6, %v742_v58  ;;  %1715 = vmatprep.mubr.msk.f32.mxu0 %vm467_vm0, %v441_v59  ;;  %v1366_v41 = vld [vmem:[%s2394_s11] sm:$0xff]  ;;  %v890_v42 = vld [vmem:[%s2390_s7 + $0xb0] sm:$0xff]  ;;  %v1367_v43 = vld [vmem:[%s2394_s11 + $0x8] sm:$0xf]  ;;  %v2283_v58 = vrot.slane %v2044_v12, %v617_v51  ;;  %v625_v59 = vsub.s32 3, %v2013_v1 }
  0x2c   : > { %1786 = vmatpush3.msk.msra.mxu1 %vm975_vm5, %v901_v52  ;;  %1742 = vmatprep.mubr.msk.f32.mxu1 %vm902_vm8, %v874_v61  ;;  %v1403_v22 = vrot.slane %v1401_v17, 4  ;;  %v891_v44 = vld [vmem:[%s2390_s7 + $0xb8] sm:$0xff] }
  0x2d   : > { %1732 = vmatpush3.msk.msra.mxu0 %vm975_vm5, %v901_v52 }
  0x2e   : > { %1716 = vmatmul.mubr.msk.f32.gmra.mxu0 %vm467_vm0, %v442_v5  ;;  %1769 = vmatprep.subr.msk.mxu0 %vm650_vm3, %v1221_v62  ;;  %v2290_v5 = vrot.slane %v2044_v12, %v625_v59 }
  0x2f   : > { %1743 = vmatmul.mubr.msk.f32.vlgmr.msra.gmra.mxu1 %vm902_vm8, %v875_v6  ;;  %1718 = vmatprep.mubr.msk.f32.mxu0 %vm467_vm0, %v443_v7 }
  0x30   : > { %1745 = vmatprep.mubr.msk.f32.mxu1 %vm902_vm8, %v876_v9 }
  0x32   : > { %1719 = vmatmul.mubr.msk.f32.gmra.mxu0 %vm467_vm0, %v444_v13 }
  0x33   : > { %1746 = vmatmul.mubr.msk.f32.gmra.mxu1 %vm902_vm8, %v877_v14  ;;  %1733 = vmatprep.mubr.msk.f32.mxu0 %vm902_vm8, %v868_v15 }
  0x34   : > { %1748 = vmatprep.mubr.msk.f32.mxu1 %vm902_vm8, %v878_v16 }
  0x36   : > { %1734 = vmatmul.mubr.msk.f32.vlgmr.msra.gmra.mxu0 %vm902_vm8, %v869_v18 }
  0x37   : > { %1749 = vmatmul.mubr.msk.f32.gmra.mxu1 %vm902_vm8, %v879_v19  ;;  %1736 = vmatprep.mubr.msk.f32.mxu0 %vm902_vm8, %v870_v20 }
  0x38   : > { %1751 = vmatprep.mubr.msk.f32.mxu1 %vm902_vm8, %v880_v21  ;;  %1770 = vmatpush3.msk.msra.mxu0 %vm650_vm3, %v1221_v62 }
  0x39   : > { %1780 = vmatprep.subr.msk.mxu0 %vm783_vm4, %v1403_v22 }
  0x3a   : > { %1737 = vmatmul.mubr.msk.f32.gmra.mxu0 %vm902_vm8, %v871_v23 }
  0x3b   : > { %1752 = vmatmul.mubr.msk.f32.gmra.mxu1 %vm902_vm8, %v881_v24  ;;  %1739 = vmatprep.mubr.msk.f32.mxu0 %vm902_vm8, %v872_v25 }
  0x3c   : > { %1754 = vmatprep.mubr.msk.f32.mxu1 %vm902_vm8, %v882_v26 }
  0x3e   : > { %1740 = vmatmul.mubr.msk.f32.gmra.mxu0 %vm902_vm8, %v873_v27 }
  0x3f   : > { %1755 = vmatmul.mubr.msk.f32.gmra.mxu1 %vm902_vm8, %v883_v28  ;;  %1771 = vmatprep.mubr.msk.f32.mxu0 %vm643_vm1, %v1206_v29 }
  0x40   : > { %1757 = vmatprep.mubr.msk.f32.mxu1 %vm902_vm8, %v884_v30 }
  0x42   : > { %1772 = vmatmul.mubr.msk.f32.vlgmr.msra.gmra.mxu0 %vm643_vm1, %v1207_v31 }
  0x43   : > { %1758 = vmatmul.mubr.msk.f32.gmra.mxu1 %vm902_vm8, %v885_v32  ;;  %1774 = vmatprep.mubr.msk.f32.mxu0 %vm643_vm1, %v1208_v33 }
  0x44   : > { %1760 = vmatprep.mubr.msk.f32.mxu1 %vm902_vm8, %v886_v34  ;;  %1781 = vmatpush3.msk.msra.mxu0 %vm783_vm4, %v1403_v22 }
  0x46   : > { %1775 = vmatmul.mubr.msk.f32.gmra.mxu0 %vm643_vm1, %v1209_v35 }
  0x47   : > { %1761 = vmatmul.mubr.msk.f32.gmra.mxu1 %vm902_vm8, %v887_v36  ;;  %1777 = vmatprep.mubr.msk.f32.mxu0 %vm643_vm1, %v1210_v37 }
  0x48   : > { %1763 = vmatprep.mubr.msk.f32.mxu1 %vm902_vm8, %v888_v38 }
  0x4a   : > { %1778 = vmatmul.mubr.msk.f32.gmra.mxu0 %vm643_vm1, %v1211_v39 }
  0x4b   : > { %1764 = vmatmul.mubr.msk.f32.gmra.mxu1 %vm902_vm8, %v889_v40  ;;  %1782 = vmatprep.mubr.msk.f32.mxu0 %vm779_vm6, %v1366_v41 }
  0x4c   : > { %1766 = vmatprep.mubr.msk.f32.mxu1 %vm902_vm8, %v890_v42 }
  0x4e   : > { %1783 = vmatmul.mubr.msk.f32.vlgmr.msra.gmra.mxu0 %vm779_vm6, %v1367_v43 }
  0x4f   : > { %1767 = vmatmul.mubr.msk.f32.gmra.mxu1 %vm902_vm8, %v891_v44 }
  0xe6   : > { %v1711_v48 = vpop.f32.mrf.mxu0 }
  0xe7   : > { %v1725_v49 = vpop.f32.mrf.mxu1  ;;  %v606_v53 = vmul.f32 %v1711_v48, %v2274_v47 }
  0xe8   : > { %v562_v52 = vpop.f32.mrf.mxu0 }
  0xe9   : > { %v720_v54 = vpop.f32.mrf.mxu1  ;;  %v605_v61 = vmul.f32 %v2274_v47, %v562_v52 }
  0xea   : > { %v1714_v55 = vpop.f32.mrf.mxu0 }
  0xeb   : > { %v612_v56 = vmul.f32 %v1714_v55, %v2277_v50  ;;  %v852_v57 = vpop.f32.mrf.mxu1 }
  0xec   : > { %v572_v60 = vpop.f32.mrf.mxu0 }
  0xed   : > { %v614_v62 = vadd.f32 %v612_v56, %v606_v53  ;;  %v611_v63 = vmul.f32 %v2277_v50, %v572_v60  ;;  %v1730_v0 = vpop.f32.mrf.mxu1 }
  0xee   : > { %v1717_v2 = vpop.f32.mrf.mxu0 }
  0xef   : > { %v620_v3 = vmul.f32 %v1717_v2, %v2283_v58  ;;  %v1744_v4 = vpop.f32.mrf.mxu1  ;;  %v613_v7 = vadd.f32 %v611_v63, %v605_v61 }
  0xf0   : > { %v582_v6 = vpop.f32.mrf.mxu0  ;;  %v1171_v46 = vmul.f32 %v1744_v4, %v2277_v50 }
  0xf1   : > { %v622_v8 = vadd.f32 %v620_v3, %v614_v62  ;;  %v619_v9 = vmul.f32 %v2283_v58, %v582_v6  ;;  %v1075_v1 = vpop.f32.mrf.mxu1 }
  0xf2   : > { %v1720_v10 = vpop.f32.mrf.mxu0  ;;  %v1170_v53 = vmul.f32 %v1075_v1, %v2277_v50 }
  0xf3   : > { %v628_v11 = vmul.f32 %v1720_v10, %v2290_v5  ;;  %v1747_v13 = vpop.f32.mrf.mxu1  ;;  %v621_v15 = vadd.f32 %v619_v9, %v613_v7 }
  0xf4   : > { %v592_v14 = vpop.f32.mrf.mxu0  ;;  %v1173_v55 = vmul.f32 %v1747_v13, %v2277_v50 }
  0xf5   : > { %v630_v16 = vadd.f32 %v628_v11, %v622_v8  ;;  %v627_v17 = vmul.f32 %v2290_v5, %v592_v14  ;;  %v1085_v18 = vpop.f32.mrf.mxu1 }
  0xf6   : > { %v1735_v19 = vpop.f32.mrf.mxu0  ;;  %v1172_v59 = vmul.f32 %v1085_v18, %v2277_v50 }
  0xf7   : > { %v629_v20 = vadd.f32 %v627_v17, %v621_v15  ;;  %v1750_v21 = vpop.f32.mrf.mxu1  ;;  %v726_v23 = vadd.f32 %v1725_v49, %v630_v16  ;;  %v1165_v44 = vmul.f32 %v1735_v19, %v2274_v47 }
  0xf8   : > { %v1045_v22 = vpop.f32.mrf.mxu0  ;;  %v1175_v62 = vmul.f32 %v1750_v21, %v2277_v50 }
  0xf9   : > { %v721_v24 = vadd.f32 %v720_v54, %v629_v20  ;;  %v1095_v25 = vpop.f32.mrf.mxu1  ;;  %v737_v30 = vmul.f32 %v726_v23, %v2290_v5  ;;  %v735_v35 = vmul.f32 %v726_v23, %v2283_v58  ;;  %v1164_v54 = vmul.f32 %v1045_v22, %v2274_v47 }
  0xfa   : > { %v1738_v26 = vpop.f32.mrf.mxu0  ;;  %v1177_v60 = vadd.f32 %v1171_v46, %v1165_v44  ;;  %v1174_v2 = vmul.f32 %v1095_v25, %v2277_v50 }
  0xfb   : > { %v730_v27 = vmul.f32 %v721_v24, %v2277_v50  ;;  %v1753_v28 = vpop.f32.mrf.mxu1  ;;  %v729_v31 = vmul.f32 %v721_v24, %v2274_v47  ;;  %v739_v39 = vrot.slane %v737_v30, 4  ;;  %v1176_v8 = vadd.f32 %v1170_v53, %v1164_v54 }
  0xfc   : > { %v1055_v29 = vpop.f32.mrf.mxu0  ;;  %v1183_v49 = vmul.f32 %v1753_v28, %v2283_v58 }
  0xfd   : > { %v732_v32 = vrot.slane %v730_v27, 4  ;;  %v1105_v33 = vpop.f32.mrf.mxu1  ;;  %v1166_v63 = vmul.f32 %v1055_v29, %v2274_v47 }
  0xfe   : > { %v1741_v34 = vpop.f32.mrf.mxu0  ;;  %v1189_v3 = vadd.f32 %v1183_v49, %v1177_v60  ;;  %v1182_v4 = vmul.f32 %v1105_v33, %v2283_v58 }
  0xff   : > { %v734_v36 = vadd.f32 %v732_v32, %v729_v31  ;;  %v1756_v37 = vpop.f32.mrf.mxu1  ;;  %v1169_v9 = vmul.f32 %v1741_v34, %v2274_v47  ;;  %v1178_v18 = vadd.f32 %v1172_v59, %v1166_v63 }
 0x100   : > { %v1065_v38 = vpop.f32.mrf.mxu0  ;;  %v1185_v1 = vmul.f32 %v1756_v37, %v2283_v58  ;;  %v1188_v21 = vadd.f32 %v1182_v4, %v1176_v8 }
 0x101   : > { %v736_v40 = vadd.f32 %v735_v35, %v734_v36  ;;  %v1115_v41 = vpop.f32.mrf.mxu1  ;;  %v1168_v11 = vmul.f32 %v1065_v38, %v2274_v47  ;;  %v1181_v27 = vadd.f32 %v1175_v62, %v1169_v9 }
 0x102   : > { %v1773_v42 = vpop.f32.mrf.mxu0  ;;  %v1184_v10 = vmul.f32 %v1115_v41, %v2283_v58 }
 0x103   : > { %v741_v43 = vadd.f32 %v739_v39, %v736_v40  ;;  %v1759_v45 = vpop.f32.mrf.mxu1  ;;  %v1180_v32 = vadd.f32 %v1174_v2, %v1168_v11 }
 0x104   : > { %v1309_v52 = vpop.f32.mrf.mxu0  ;;  %v1187_v19 = vmul.f32 %v1759_v45, %v2283_v58  ;;  %v1190_v28 = vadd.f32 %v1184_v10, %v1178_v18 }
 0x105   : > { %v853_v48 = vadd.f32 %v852_v57, %v741_v43  ;;  %v1125_v51 = vpop.f32.mrf.mxu1  ;;  %v1167_v57 = vmul.f32 %v1738_v26, %v2274_v47 }
 0x106   : > { %v1776_v6 = vpop.f32.mrf.mxu0  ;;  %v1186_v29 = vmul.f32 %v1125_v51, %v2283_v58  ;;  %v1193_v36 = vadd.f32 %v1187_v19, %v1181_v27 }
 0x107   : > { %v856_v56 = vmul.f32 %v853_v48, %v2044_v12  ;;  %v1762_v61 = vpop.f32.mrf.mxu1  ;;  %v1179_v17 = vadd.f32 %v1173_v55, %v1167_v57 }
 0x108   : > { %v1195_v0 = vmul.f32 %v1762_v61, %v2290_v5  ;;  %v1319_v24 = vpop.f32.mrf.mxu0  ;;  %v1192_v44 = vadd.f32 %v1186_v29, %v1180_v32 }
 0x109   : > { %v1135_v12 = vpop.f32.mrf.mxu1  ;;  %v858_v7 = vrot.slane %v856_v56, 1  ;;  %v861_v16 = vrot.slane %v856_v56, 2  ;;  %v864_v26 = vrot.slane %v856_v56, 3  ;;  %v1191_v31 = vadd.f32 %v1185_v1, %v1179_v17 }
 0x10a   : > { %v1201_v13 = vadd.f32 %v1195_v0, %v1189_v3  ;;  %v1194_v20 = vmul.f32 %v1135_v12, %v2290_v5  ;;  %v1779_v43 = vpop.f32.mrf.mxu0 }
 0x10b   : > { %v1765_v14 = vpop.f32.mrf.mxu1  ;;  %v860_v15 = vadd.f32 %v858_v7, %v856_v56 }
 0x10c   : > { %v1197_v22 = vmul.f32 %v1765_v14, %v2290_v5  ;;  %v1315_v33 = vadd.f32 %v1773_v42, %v1201_v13  ;;  %v1200_v37 = vadd.f32 %v1194_v20, %v1188_v21  ;;  %v1329_v56 = vpop.f32.mrf.mxu0 }
 0x10d   : > { %v1145_v23 = vpop.f32.mrf.mxu1  ;;  %v863_v25 = vadd.f32 %v861_v16, %v860_v15 }
 0x10e   : > { %v1196_v30 = vmul.f32 %v1145_v23, %v2290_v5  ;;  %v1203_v40 = vadd.f32 %v1197_v22, %v1191_v31  ;;  %v1340_v42 = vmul.f32 %v1315_v33, %v2277_v50  ;;  %v1310_v49 = vadd.f32 %v1309_v52, %v1200_v37  ;;  %v1784_v9 = vpop.f32.mrf.mxu0 }
 0x10f   : > { %v1768_v34 = vpop.f32.mrf.mxu1  ;;  %v866_v35 = vadd.f32 %v864_v26, %v863_v25  ;;  %v1339_v59 = vmul.f32 %v1315_v33, %v2274_v47 }
 0x110   : > { %v1199_v38 = vmul.f32 %v1768_v34, %v2290_v5  ;;  %v1202_v39 = vadd.f32 %v1196_v30, %v1190_v28  ;;  %v1325_v55 = vadd.f32 %v1776_v6, %v1203_v40  ;;  %v1344_v57 = vrot.slane %v1340_v42, 4  ;;  %v1478_v15 = vpop.f32.mrf.mxu0 }
 0x111   : > { %v1155_v41 = vpop.f32.mrf.mxu1  ;;  %867 = vst [vmem:[%s2326_s21] sm:$0x1] %v866_v35  ;;  %v1338_v63 = vmul.f32 %v1310_v49, %v2274_v47 }
 0x112   : > { %v1320_v45 = vadd.f32 %v1319_v24, %v1202_v39  ;;  %v1198_v46 = vmul.f32 %v1155_v41, %v2290_v5  ;;  %v1205_v48 = vadd.f32 %v1199_v38, %v1193_v36  ;;  %v1351_v3 = vmul.f32 %v1325_v55, %v2283_v58 }
 0x114   : > { %v1341_v51 = vmul.f32 %v1320_v45, %v2277_v50  ;;  %v1335_v53 = vadd.f32 %v1779_v43, %v1205_v48  ;;  %v1204_v54 = vadd.f32 %v1198_v46, %v1192_v44 }
 0x116   : > { %v1345_v60 = vrot.slane %v1341_v51, 4  ;;  %v1356_v61 = vmul.f32 %v1335_v53, %v2290_v5  ;;  %v1330_v62 = vadd.f32 %v1329_v56, %v1204_v54 }
 0x118   : > { %v1350_v0 = vadd.f32 %v1345_v60, %v1339_v59  ;;  %v1352_v2 = vmul.f32 %v1330_v62, %v2283_v58  ;;  %v1355_v52 = vmul.f32 %v1330_v62, %v2290_v5  ;;  %v1346_v4 = vsel %vm492_vm2, %v1344_v57, %v1345_v60 }
 0x119   : > { %v1360_v12 = vrot.slane %v1356_v61, 4  ;;  %v1349_v8 = vadd.f32 %v1346_v4, %v1338_v63 }
 0x11a   : > { %v1359_v6 = vrot.slane %v1355_v52, 4  ;;  %v1354_v7 = vadd.f32 %v1352_v2, %v1350_v0 }
 0x11b   : > { %v1353_v10 = vadd.f32 %v1351_v3, %v1349_v8 }
 0x11c   : > { %v1365_v1 = vadd.f32 %v1360_v12, %v1354_v7  ;;  %v1361_v11 = vsel %vm492_vm2, %v1359_v6, %v1360_v12 }
 0x11d   : > { %v1364_v14 = vadd.f32 %v1361_v11, %v1353_v10 }
 0x11e   : > { %v1484_v13 = vadd.f32 %v1784_v9, %v1365_v1 }
 0x11f   : > { %v1479_v17 = vadd.f32 %v1478_v15, %v1364_v14 }
 0x120   : > { %v1494_v16 = vmul.f32 %v1484_v13, %v2283_v58  ;;  %v1502_v21 = vmul.f32 %v1484_v13, %v2290_v5 }
 0x121   : > { %v1488_v18 = vmul.f32 %v1479_v17, %v2277_v50  ;;  %v1493_v20 = vmul.f32 %v1479_v17, %v2283_v58  ;;  %v1487_v22 = vmul.f32 %v1479_v17, %v2274_v47 }
 0x122   : > { %v1498_v19 = vrot.slane %v1494_v16, 6  ;;  %v1504_v27 = vrot.slane %v1502_v21, 1 }
 0x123   : > { %v1490_v23 = vrot.slane %v1488_v18, 3  ;;  %v1497_v24 = vrot.slane %v1493_v20, 6 }
 0x125   : > { %v1492_v25 = vadd.f32 %v1490_v23, %v1487_v22  ;;  %v1499_v26 = vsel %vm650_vm3, %v1497_v24, %v1498_v19 }
 0x127   : > { %v1501_v28 = vadd.f32 %v1499_v26, %v1492_v25 }
 0x129   : > { %v1506_v50 = vadd.f32 %v1504_v27, %v1501_v28 }
 0x12b   : > { %1507 = vst [vmem:[%s2326_s21 + $0x1] sm:$0x7] %v1506_v50 }
 0x12c   : > { %1841 = shalt.err (!%p1838_p3)
}
 0x12d   : > { %s1842_s17 = scalar_lea.hbm %s1520_s24, 64  ;;  %s1846_s30 = scalar_lea.hbm %s2396_s13, 128 }
 0x12e   : > { %p1843_p4 = scmp.ne.s32.totalorder %s1520_s24, %s1842_s17  ;;  %p1847_p9 = scmp.lt.s32.totalorder %s1520_s24, %s2396_s13 }
 0x12f   : > { %p1848_p10 = scmp.lt.s32.totalorder %s1846_s30, %s1842_s17 }
 0x130   : > { %p1844_p7 = pnand %p1843_p4, %p2001_p5 }
 0x131   : > { %p1849_p11 = por %p1848_p10, %p1847_p9 }
 0x132   : > { %p1845_p8 = pneg %p1844_p7 }
 0x134   : > { %p1850_p12 = pnand %p1849_p11, %p1845_p8 }
 0x136   : > { %1853 = shalt.err (!%p1850_p12)
}
 0x137   : > { %1787 = dma.vmem_to_hbm [thread:$0]  (%p2001_p5), %s1523_s20, 64, %s1520_s24, %s1509_s14  }
 0x138 PF: > { %p1793_p13 = scmp.ge.s32.totalorder %s1888_s28, 2  ;;  %s1534_s15 = sand.u32 1, %s1876_s25  }
 0x139   : > { %s1535_s16 = scalar_lea.sflag [#allocation3], %s1534_s15 }
 0x13a   : > { %p1790_p0 = pnand %p1793_p13, %p2005_p6 }
 0x13c   : > { %p1791_p1 = pneg %p1790_p0 }
 0x13e   : > { %1871 = dma.done.wait (%p1791_p1), %s1535_s16, 64  }
 0x13f   : > { %1873 = vsyncadd (%p1791_p1), %s1535_s16, 4294967232  ;;  %s2408_s28 = sld [smem:[#allocation6_spill]]  ;;  %s2411_s25 = smov %s1880_s26 }
 0x140   : > { %s2409_s29 = sld [smem:[#allocation5_spill]] }
 0x141   : > { %s2410_s27 = sld [smem:[#allocation7_spill]] }
 0x145   : > { %p23_p2 = scmp.ge.s32.totalorder %s2408_s28, 4  }
 0x146   : > { %s2412_s26 = smov %s2409_s29 }
 0x147   :  { %25 = sbr.rel (!%p23_p2) target bundleno = 3 (0x3), region = 119 }
 0x14c   :  { %1540 = vsyncpa [#allocation3], 1 }
 0x14d   :  { %1542 = vsyncpa [#allocation3 + $0x1], 1 }

</bundles_post_ra>
